<compile_context>
chip_gen: v7x
topology: tpu7x:2x2x1
jax: 0.10.0
libtpu: 0.0.40
codegen_flags: <defaults>
</compile_context>

<pallas_src>
import functools

import jax
import jax.numpy as jnp
from jax.experimental import pallas as pl
from jax.experimental.pallas import tpu as pltpu

LANE = 128
SUBLANE = 8


def _round_up(x, m):
    return ((x + m - 1) // m) * m


def _vmem_capacity_bytes():
    try:
        return int(pltpu.get_tpu_info().vmem_capacity_bytes)
    except Exception:
        return 64 * 1024 * 1024  # conservative fallback (v7x per-TC VMEM)


def _vmem_footprint_bytes(tile_b, in_sz, hid_p, hid2_p, out_p, bias_w,
                          cd_bytes, out_bytes):
    """Rough per-grid-step VMEM footprint estimate (with double-buffering)."""
    bx = tile_b * in_sz * 4 * 2                 # f32 x tile, double-buffered
    bx += tile_b * in_sz * cd_bytes             # in-kernel bf16 cast copy
    bw = (in_sz * hid_p + hid_p * hid2_p + hid2_p * out_p) * cd_bytes * 2
    bb = 8 * bias_w * 4 * 2                     # packed biases (sublane-padded)
    bh = tile_b * (hid_p * (4 + cd_bytes) + hid2_p * (4 + cd_bytes) + out_p * 4)
    bo = tile_b * out_p * out_bytes * 2         # output tile, double-buffered
    return int(1.25 * (bx + bw + bb + bh + bo))  # fudge for compiler temporaries


def mlp_kernel(x_ref, w1_ref, w2_ref, w3_ref, b_ref, o_ref):
    # Fused 3-layer MLP on a (tile_b, in_sz) batch tile resident in VMEM.
    # x arrives as f32 and is cast to the (bf16) compute dtype here, so the
    # wrapper never does a separate pad/cast pass over x in HBM.
    b = b_ref[...]                               # (3, bias_w) f32 packed biases
    x = x_ref[...].astype(w1_ref.dtype)          # f32 -> bf16 inside VMEM

    h1 = jnp.dot(x, w1_ref[...], preferred_element_type=jnp.float32)
    h1 = jnp.maximum(h1 + b[0:1, : h1.shape[1]], 0.0)

    h2 = jnp.dot(h1.astype(w2_ref.dtype), w2_ref[...],
                 preferred_element_type=jnp.float32)
    h2 = jnp.maximum(h2 + b[1:2, : h2.shape[1]], 0.0)

    h3 = jnp.dot(h2.astype(w3_ref.dtype), w3_ref[...],
                 preferred_element_type=jnp.float32)
    o_ref[...] = (h3 + b[2:3, : h3.shape[1]]).astype(o_ref.dtype)


def prepare_params(params, compute_dtype=jnp.bfloat16):
    """One-time (outside per-call path) lane-padding + low-precision cast of weights.

    All feature dims are padded to multiples of 128 with zeros so every matmul
    and elementwise op in the kernel is full-lane; padded columns/rows are zero
    so the logical result is unchanged.
    """
    # TODO(synk): on v7x an fp8(e4m3) weight path here would halve weight HBM/VMEM
    # and double MXU throughput (not applicable to v5e/v6e int8/int4 MXUs).
    w1, w2, w3 = params["w1"], params["w2"], params["w3"]
    in_sz, hid = w1.shape
    hid2 = w2.shape[1]
    out_sz = w3.shape[1]
    hid_p = _round_up(hid, LANE)
    hid2_p = _round_up(hid2, LANE)
    out_p = _round_up(out_sz, LANE)

    w1p = jnp.pad(w1, ((0, 0), (0, hid_p - hid))).astype(compute_dtype)
    w2p = jnp.pad(w2, ((0, hid_p - hid), (0, hid2_p - hid2))).astype(compute_dtype)
    w3p = jnp.pad(w3, ((0, hid2_p - hid2), (0, out_p - out_sz))).astype(compute_dtype)

    bias_w = max(hid_p, hid2_p, out_p)

    def _row(b):
        b = b.reshape(-1).astype(jnp.float32)
        return jnp.pad(b, (0, bias_w - b.shape[0]))

    bias = jnp.stack([_row(params["b1"]), _row(params["b2"]), _row(params["b3"])])

    return {"w1": w1p, "w2": w2p, "w3": w3p, "bias": bias, "out_size": out_sz}


@functools.partial(jax.jit, static_argnames=("out_size", "tile_b", "out_dtype"))
def _forward(x, w1p, w2p, w3p, bias, *, out_size, tile_b=512, out_dtype=jnp.float32):
    B, in_sz = x.shape
    hid_p = w1p.shape[1]
    hid2_p = w2p.shape[1]
    out_p = w3p.shape[1]
    bias_w = bias.shape[1]
    cd_bytes = jnp.dtype(w1p.dtype).itemsize
    out_bytes = jnp.dtype(out_dtype).itemsize

    # ---- batch tile selection ------------------------------------------------
    # Align to the compute dtype's sublane packing (16 rows for bf16, 8 for f32).
    row_pack = max(1, 4 // cd_bytes) * SUBLANE
    b_min = _round_up(B, row_pack)
    tile = _round_up(min(tile_b, b_min), row_pack)
    # Guarantee >= 2 grid steps whenever the batch allows it so the "parallel"
    # batch axis actually shards across both v7x TensorCores (the extra ~0.35us
    # grid step is noise on single-TC v5e/v6e).
    if tile >= b_min and b_min >= 2 * row_pack:
        tile = _round_up((b_min + 1) // 2, row_pack)

    # ---- VMEM budget: per-TC capacity minus headroom, tile shrunk to fit ------
    vmem_cap = _vmem_capacity_bytes()
    budget = max(32 * 1024 * 1024, vmem_cap - 16 * 1024 * 1024)
    while tile > row_pack and _vmem_footprint_bytes(
            tile, in_sz, hid_p, hid2_p, out_p, bias_w, cd_bytes, out_bytes) > budget:
        tile = _round_up(tile // 2, row_pack)

    b_pad = _round_up(B, tile)
    xp = jnp.pad(x, ((0, b_pad - B), (0, 0))) if b_pad != B else x  # no dtype cast here
    grid = (b_pad // tile,)

    flops = 2 * b_pad * (in_sz * hid_p + hid_p * hid2_p + hid2_p * out_p)
    bytes_accessed = (
        xp.size * xp.dtype.itemsize
        + (w1p.size + w2p.size + w3p.size) * cd_bytes
        + bias.size * 4
        + b_pad * out_p * out_bytes
    )

    # TODO(synk): for very wide input_size/hidden_size, add a K-tiling grid axis
    # ("arbitrary", f32 VMEM accumulator + pl.when init/finalize) so the x tile and
    # w1 block stay bounded; threshold is ~2x lower on v7x (64 MiB) than v5e/v6e.
    out = pl.pallas_call(
        mlp_kernel,
        out_shape=jax.ShapeDtypeStruct((b_pad, out_p), out_dtype),
        grid_spec=pltpu.PrefetchScalarGridSpec(
            num_scalar_prefetch=0,
            grid=grid,
            in_specs=[
                pl.BlockSpec((tile, in_sz), lambda i: (i, 0)),   # x (f32; cast in-kernel)
                # TODO(synk): single-buffer these grid-invariant blocks
                # (pipeline_mode=pl.Buffered(1)) to halve weight VMEM on v7x.
                pl.BlockSpec((in_sz, hid_p), lambda i: (0, 0)),  # w1 (bf16, lane-padded)
                pl.BlockSpec((hid_p, hid2_p), lambda i: (0, 0)), # w2
                pl.BlockSpec((hid2_p, out_p), lambda i: (0, 0)), # w3
                pl.BlockSpec((3, bias_w), lambda i: (0, 0)),     # packed f32 biases
            ],
            out_specs=pl.BlockSpec((tile, out_p), lambda i: (i, 0)),
        ),
        compiler_params=pltpu.CompilerParams(
            dimension_semantics=("parallel",),   # batch tiles shard across TCs (v7x)
            vmem_limit_bytes=int(budget),
        ),
        cost_estimate=pl.CostEstimate(
            flops=int(flops), transcendentals=0, bytes_accessed=int(bytes_accessed)
        ),
    )(xp, w1p, w2p, w3p, bias)

    return out[:B, :out_size]


def base_classificator_forward(x, prepared, *, tile_b=512, out_dtype=jnp.float32):
    """x: (B, input_size) float32. prepared: output of prepare_params()."""
    return _forward(
        x, prepared["w1"], prepared["w2"], prepared["w3"], prepared["bias"],
        out_size=int(prepared["out_size"]), tile_b=tile_b, out_dtype=out_dtype,
    )


def init_params(key, input_size, hidden_size, output_size):
    """Deterministic nn.Linear-style init: U(-1/sqrt(fan_in), +1/sqrt(fan_in))."""
    def linear_init(k, fan_in, fan_out):
        kw, kb = jax.random.split(k)
        bound = 1.0 / jnp.sqrt(float(fan_in))
        w = jax.random.uniform(kw, (fan_in, fan_out), jnp.float32, -bound, bound)
        b = jax.random.uniform(kb, (1, fan_out), jnp.float32, -bound, bound)
        return w, b

    k1, k2, k3 = jax.random.split(key, 3)
    w1, b1 = linear_init(k1, input_size, hidden_size)
    w2, b2 = linear_init(k2, hidden_size, hidden_size // 2)
    w3, b3 = linear_init(k3, hidden_size // 2, output_size)
    return {"w1": w1, "b1": b1, "w2": w2, "b2": b2, "w3": w3, "b3": b3}


def reference_forward(x, p, quant_dtype=None):
    """Pure-JAX reference. quant_dtype simulates the kernel's low-precision operands."""
    if quant_dtype is not None:
        cast = lambda a: a.astype(quant_dtype).astype(jnp.float32)
    else:
        cast = lambda a: a
    h = jnp.maximum(cast(x) @ cast(p["w1"]) + p["b1"], 0.0)
    h = jnp.maximum(cast(h) @ cast(p["w2"]) + p["b2"], 0.0)
    return cast(h) @ cast(p["w3"]) + p["b3"]


if __name__ == "__main__":
    input_size, hidden_size, output_size = 32, 32, 8
    batch = 8

    key = jax.random.PRNGKey(0)
    kx, kp = jax.random.split(key)
    x = jax.random.normal(kx, (batch, input_size), jnp.float32)
    params = init_params(kp, input_size, hidden_size, output_size)
    prepared = prepare_params(params)            # one-time pad + bf16 cast of weights

    out = base_classificator_forward(x, prepared)
    out = jax.block_until_ready(out)
    assert out.shape == (batch, output_size)

    # Tight check vs a reference using the same bf16-quantized operands.
    ref_q = reference_forward(x, params, quant_dtype=jnp.bfloat16)
    assert jnp.allclose(out, ref_q, atol=2e-2, rtol=2e-2), "mismatch vs bf16 reference"

    # Loose check vs the exact f32 reference (difference = bf16 operand rounding only).
    ref = reference_forward(x, params)
    assert jnp.allclose(out, ref, atol=1e-1, rtol=1e-1), "mismatch vs f32 reference"

    # Second shape: batch not divisible by the tile -> exercises padding + 2-step grid.
    x2 = jax.random.normal(jax.random.PRNGKey(1), (25, input_size), jnp.float32)
    out2 = jax.block_until_ready(base_classificator_forward(x2, prepared))
    ref2 = reference_forward(x2, params)
    assert out2.shape == (25, output_size)
    assert jnp.allclose(out2, ref2, atol=1e-1, rtol=1e-1), "mismatch on padded batch"

    print("KERNEL_OK")
</pallas_src>

<mosaic_0001>
module attributes {stable_mosaic.version = 11 : i64} {
  func.func @mlp_kernel(%arg0: i32, %arg1: memref<16x32xf32, #tpu.memory_space<vmem>>, %arg2: memref<32x128xbf16, #tpu.memory_space<vmem>>, %arg3: memref<128x128xbf16, #tpu.memory_space<vmem>>, %arg4: memref<128x128xbf16, #tpu.memory_space<vmem>>, %arg5: memref<3x128xf32, #tpu.memory_space<vmem>>, %arg6: memref<16x128xf32, #tpu.memory_space<vmem>>) attributes {dimension_semantics = [#tpu.dimension_semantics<parallel>], iteration_bounds = array<i64: 1>, scalar_prefetch = 0 : i64, scratch_operands = 0 : i64, tpu.core_type = #tpu.core_type<tc>, window_params = [{transform_indices = @transform_0, window_bounds = array<i64: 16, 32>}, {pipeline_mode = #tpu.pipeline_mode<synchronous>, transform_indices = @transform_1, window_bounds = array<i64: 32, 128>}, {pipeline_mode = #tpu.pipeline_mode<synchronous>, transform_indices = @transform_2, window_bounds = array<i64: 128, 128>}, {pipeline_mode = #tpu.pipeline_mode<synchronous>, transform_indices = @transform_3, window_bounds = array<i64: 128, 128>}, {pipeline_mode = #tpu.pipeline_mode<synchronous>, transform_indices = @transform_4, window_bounds = array<i64: 3, 128>}, {transform_indices = @transform_5, window_bounds = array<i64: 16, 128>}]} {
    %c0 = arith.constant 0 : index
    %c0_0 = arith.constant 0 : index
    %0 = vector.load %arg5[%c0, %c0_0] : memref<3x128xf32, #tpu.memory_space<vmem>>, vector<3x128xf32>
    %c0_1 = arith.constant 0 : index
    %c0_2 = arith.constant 0 : index
    %1 = vector.load %arg1[%c0_1, %c0_2] : memref<16x32xf32, #tpu.memory_space<vmem>>, vector<16x32xf32>
    %2 = arith.truncf %1 : vector<16x32xf32> to vector<16x32xbf16>
    %c0_3 = arith.constant 0 : index
    %c0_4 = arith.constant 0 : index
    %3 = vector.load %arg2[%c0_3, %c0_4] : memref<32x128xbf16, #tpu.memory_space<vmem>>, vector<32x128xbf16>
    %cst = arith.constant dense<0.000000e+00> : vector<16x128xf32>
    %4 = tpu.matmul %2, %3, %cst {dimension_numbers = #tpu.dot_dimension_numbers<[1], [0], [0], [1], [0, 0, 1, 1], [], []>} : vector<16x32xbf16>, vector<32x128xbf16>, vector<16x128xf32> -> vector<16x128xf32>
    %5 = vector.extract_strided_slice %0 {offsets = [0, 0], sizes = [1, 128], strides = [1, 1]} : vector<3x128xf32> to vector<1x128xf32>
    %6 = vector.broadcast %5 : vector<1x128xf32> to vector<16x128xf32>
    %7 = arith.addf %4, %6 : vector<16x128xf32>
    %cst_5 = arith.constant 0.000000e+00 : f32
    %8 = vector.broadcast %cst_5 : f32 to vector<16x128xf32>
    %9 = arith.maximumf %7, %8 : vector<16x128xf32>
    %10 = arith.truncf %9 : vector<16x128xf32> to vector<16x128xbf16>
    %c0_6 = arith.constant 0 : index
    %c0_7 = arith.constant 0 : index
    %11 = vector.load %arg3[%c0_6, %c0_7] : memref<128x128xbf16, #tpu.memory_space<vmem>>, vector<128x128xbf16>
    %cst_8 = arith.constant dense<0.000000e+00> : vector<16x128xf32>
    %12 = tpu.matmul %10, %11, %cst_8 {dimension_numbers = #tpu.dot_dimension_numbers<[1], [0], [0], [1], [0, 0, 1, 1], [], []>} : vector<16x128xbf16>, vector<128x128xbf16>, vector<16x128xf32> -> vector<16x128xf32>
    %13 = vector.extract_strided_slice %0 {offsets = [1, 0], sizes = [1, 128], strides = [1, 1]} : vector<3x128xf32> to vector<1x128xf32>
    %14 = vector.broadcast %13 : vector<1x128xf32> to vector<16x128xf32>
    %15 = arith.addf %12, %14 : vector<16x128xf32>
    %cst_9 = arith.constant 0.000000e+00 : f32
    %16 = vector.broadcast %cst_9 : f32 to vector<16x128xf32>
    %17 = arith.maximumf %15, %16 : vector<16x128xf32>
    %18 = arith.truncf %17 : vector<16x128xf32> to vector<16x128xbf16>
    %c0_10 = arith.constant 0 : index
    %c0_11 = arith.constant 0 : index
    %19 = vector.load %arg4[%c0_10, %c0_11] : memref<128x128xbf16, #tpu.memory_space<vmem>>, vector<128x128xbf16>
    %cst_12 = arith.constant dense<0.000000e+00> : vector<16x128xf32>
    %20 = tpu.matmul %18, %19, %cst_12 {dimension_numbers = #tpu.dot_dimension_numbers<[1], [0], [0], [1], [0, 0, 1, 1], [], []>} : vector<16x128xbf16>, vector<128x128xbf16>, vector<16x128xf32> -> vector<16x128xf32>
    %21 = vector.extract_strided_slice %0 {offsets = [2, 0], sizes = [1, 128], strides = [1, 1]} : vector<3x128xf32> to vector<1x128xf32>
    %22 = vector.broadcast %21 : vector<1x128xf32> to vector<16x128xf32>
    %23 = arith.addf %20, %22 : vector<16x128xf32>
    %c0_13 = arith.constant 0 : index
    %c0_14 = arith.constant 0 : index
    %24 = vector.load %arg6[%c0_13, %c0_14] : memref<16x128xf32, #tpu.memory_space<vmem>>, vector<16x128xf32>
    tpu.vector_store %arg6[%c0_13, %c0_14], %23 {strides = array<i32>} : memref<16x128xf32, #tpu.memory_space<vmem>>, vector<16x128xf32>,
    return
  }
  func.func @transform_0(%arg0: i32) -> (i32, i32) {
    %c0_i32 = arith.constant 0 : i32
    %c0_i32_0 = arith.constant 0 : i32
    return %arg0, %c0_i32 : i32, i32
  }
  func.func @transform_1(%arg0: i32) -> (i32, i32) {
    %c0_i32 = arith.constant 0 : i32
    %c0_i32_0 = arith.constant 0 : i32
    %c0_i32_1 = arith.constant 0 : i32
    return %c0_i32, %c0_i32_0 : i32, i32
  }
  func.func @transform_2(%arg0: i32) -> (i32, i32) {
    %c0_i32 = arith.constant 0 : i32
    %c0_i32_0 = arith.constant 0 : i32
    %c0_i32_1 = arith.constant 0 : i32
    return %c0_i32, %c0_i32_0 : i32, i32
  }
  func.func @transform_3(%arg0: i32) -> (i32, i32) {
    %c0_i32 = arith.constant 0 : i32
    %c0_i32_0 = arith.constant 0 : i32
    %c0_i32_1 = arith.constant 0 : i32
    return %c0_i32, %c0_i32_0 : i32, i32
  }
  func.func @transform_4(%arg0: i32) -> (i32, i32) {
    %c0_i32 = arith.constant 0 : i32
    %c0_i32_0 = arith.constant 0 : i32
    %c0_i32_1 = arith.constant 0 : i32
    return %c0_i32, %c0_i32_0 : i32, i32
  }
  func.func @transform_5(%arg0: i32) -> (i32, i32) {
    %c0_i32 = arith.constant 0 : i32
    %c0_i32_0 = arith.constant 0 : i32
    return %arg0, %c0_i32 : i32, i32
  }
}

</mosaic_0001>

<bundles_post_ra>
// kernel: _forward.1
= control target key start
LH: loop header
LB: loop body
LE: loop exit
PB: predicated region body
PF: predicated region fallthrough
CT: control target
= control target key end

     0   :  { %10 = vsyncpa [#allocation3], 0  ;;  %s615_s0 = inlined_call_operand.vmem [shape: f32[16,32], index: 0, kind: input, shape index: {}]   ;;  %s616_s1 = inlined_call_operand.vmem [shape: bf16[32,128], index: 1, kind: input, shape index: {}]   ;;  %s617_s2 = inlined_call_operand.hbm [shape: bf16[128,128], index: 2, kind: input, shape index: {}]   ;;  %s618_s3 = inlined_call_operand.hbm [shape: bf16[128,128], index: 3, kind: input, shape index: {}]   ;;  %s619_s4 = inlined_call_operand.vmem [shape: f32[3,128], index: 4, kind: input, shape index: {}]   ;;  %s620_s5 = inlined_call_operand.vmem [shape: f32[16,128], index: 5, kind: output, shape index: {}]  }
   0x1   :  { %11 = vsyncpa [#allocation5], 0  ;;  %s510_s18 = smov [#allocation2]   ;;  %s462_s22 = scalar_lea.hbm %s617_s2, 1024 }
   0x2   :  { %s21_s19 = sshll.u32 %s510_s18, 4  ;;  %p463_p0 = scmp.ne.s32.totalorder %s617_s2, %s462_s22  ;;  %s22_s19 = int_to_ptr.vmem [resolvable:$true] %s21_s19 }
   0x3   :  { %p466_p1 = scmp.lt.u32.totalorder %s462_s22, %s617_s2 }
   0x5   :  { %p468_p2 = pnand %p466_p1, %p463_p0 }
   0x7   :  { %471 = shalt.err (!%p468_p2)
}
   0x8   :  { %s472_s27 = scalar_lea.vmem %s22_s19, 1024  ;;  %p477_p4 = scmp.lt.s32.totalorder %s22_s19, %s22_s19 }
   0x9   :  { %p473_p3 = scmp.ne.s32.totalorder %s22_s19, %s472_s27  ;;  %p478_p5 = scmp.lt.s32.totalorder %s472_s27, %s472_s27 }
   0xb   :  { %p479_p6 = por %p478_p5, %p477_p4 }
   0xd   :  { %p480_p7 = pnand %p479_p6, %p473_p3 }
   0xf   :  { %483 = shalt.err (!%p480_p7)
}
  0x10   :  { %s511_s28 = smov 64   ;;  %s512_s29 = smov 4  }
  0x11   :  { %27 = dma.hbm_to_vmem [thread:$0]  %s617_s2, 1024, %s22_s19, [#allocation3], %s511_s28, %s511_s28, %s512_s29  }
  0x12   :  { %s513_s7 = smov [#allocation4]   ;;  %s484_s11 = scalar_lea.hbm %s618_s3, 1024 }
  0x13   :  { %s33_s8 = sshll.u32 %s513_s7, 4  ;;  %p485_p8 = scmp.ne.s32.totalorder %s618_s3, %s484_s11  ;;  %s34_s8 = int_to_ptr.vmem [resolvable:$true] %s33_s8 }
  0x14   :  { %p488_p9 = scmp.lt.u32.totalorder %s484_s11, %s618_s3 }
  0x16   :  { %p490_p10 = pnand %p488_p9, %p485_p8 }
  0x18   :  { %493 = shalt.err (!%p490_p10)
}
  0x19   :  { %s494_s16 = scalar_lea.vmem %s34_s8, 1024  ;;  %p499_p12 = scmp.lt.s32.totalorder %s34_s8, %s34_s8 }
  0x1a   :  { %p495_p11 = scmp.ne.s32.totalorder %s34_s8, %s494_s16  ;;  %p500_p13 = scmp.lt.s32.totalorder %s494_s16, %s494_s16 }
  0x1c   :  { %p501_p0 = por %p500_p13, %p499_p12 }
  0x1e   :  { %p502_p1 = pnand %p501_p0, %p495_p11 }
  0x20   :  { %505 = shalt.err (!%p502_p1)
}
  0x21   :  { %39 = dma.hbm_to_vmem [thread:$0]  %s618_s3, 1024, %s34_s8, [#allocation5], %s511_s28, %s511_s28, %s512_s29  }
  0x22   :  { %506 = dma.done.wait [#allocation3], 1024  }
  0x23   :  { %507 = vsyncadd [#allocation3], 4294966272 }
  0x24   :  { %508 = dma.done.wait [#allocation5], 1024  }
  0x25   :  { %509 = vsyncadd [#allocation5], 4294966272  ;;  %v514_v0 = vmov 0.0   ;;  %vm515_vm0 = vmmov 0   ;;  %v444_v1 = vld [vmem:[%s616_s1] sm:$0xff]   ;;  %v445_v2 = vld [vmem:[%s616_s1 + $0x8] sm:$0xff]   ;;  %v57_v20 = vlaneseq }
  0x26   :  { %390 = vmatprep.subr.bf16.mxu0 %v514_v0  ;;  %394 = vmatprep.mubr.msk.bf16.mxu0 %vm515_vm0, %v514_v0  ;;  %v50_v3 = vld [vmem:[%s615_s0] sm:$0xff]  ;;  %v51_v4 = vld [vmem:[%s615_s0 + $0x8] sm:$0xff]  ;;  %v446_v5 = vld [vmem:[#allocation2] sm:$0xff]   ;;  %vm73_vm1 = vcmask 261120  }
  0x27   :  { %398 = vmatprep.subr.bf16.mxu1 %v514_v0  ;;  %414 = vmatprep.mubr.msk.bf16.mxu1 %vm515_vm0, %v514_v0  ;;  %v52_v6 = vpack.c.bf16 %v51_v4, %v50_v3  ;;  %v447_v7 = vld [vmem:[#allocation2 + $0x8] sm:$0xff]   ;;  %v448_v8 = vld [vmem:[#allocation2 + $0x10] sm:$0xff]   ;;  %v449_v9 = vld [vmem:[#allocation2 + $0x18] sm:$0xff]   ;;  %v58_v21 = vshrl.u32 %v57_v20, 7 }
  0x28   :  { %391 = vmatpush3.bf16.msra.mxu0 %v444_v1  ;;  %399 = vmatpush3.bf16.msra.mxu1 %v446_v5  ;;  %v450_v10 = vld [vmem:[#allocation2 + $0x20] sm:$0xff]   ;;  %v451_v11 = vld [vmem:[#allocation2 + $0x28] sm:$0xff]   ;;  %v452_v12 = vld [vmem:[#allocation2 + $0x30] sm:$0xff]  }
  0x29   :  { %392 = vmatprep.subr.bf16.mxu0 %v514_v0  ;;  %400 = vmatprep.subr.bf16.mxu1 %v514_v0  ;;  %v453_v13 = vld [vmem:[#allocation2 + $0x38] sm:$0xff]   ;;  %v454_v14 = vld [vmem:[#allocation4] sm:$0xff]   ;;  %v455_v15 = vld [vmem:[#allocation4 + $0x8] sm:$0xff]   ;;  %v59_v22 = vsub.s32 0, %v58_v21  ;;  %v139_v36 = vsub.s32 1, %v58_v21  ;;  %v251_v47 = vsub.s32 2, %v58_v21 }
  0x2a   :  { %v456_v16 = vld [vmem:[#allocation4 + $0x10] sm:$0xff]   ;;  %v457_v17 = vld [vmem:[#allocation4 + $0x18] sm:$0xff]   ;;  %v458_v18 = vld [vmem:[#allocation4 + $0x20] sm:$0xff]  }
  0x2b   :  { %v459_v19 = vld [vmem:[#allocation4 + $0x28] sm:$0xff]   ;;  %v49_v23 = vld [vmem:[%s619_s4] sm:$0x7]  ;;  %v461_v35 = vld [vmem:[#allocation4 + $0x38] sm:$0xff]  }
  0x2c   :  { %393 = vmatpush3.bf16.msra.mxu0 %v445_v2  ;;  %401 = vmatpush3.bf16.msra.mxu1 %v447_v7  ;;  %v60_v24 = vrot.slane %v49_v23, %v59_v22  ;;  %v460_v34 = vld [vmem:[#allocation4 + $0x30] sm:$0xff]   ;;  %v140_v37 = vrot.slane %v49_v23, %v139_v36  ;;  %v252_v48 = vrot.slane %v49_v23, %v251_v47 }
  0x2d   :  { %418 = vmatprep.subr.bf16.mxu0 %v514_v0  ;;  %402 = vmatprep.subr.bf16.mxu1 %v514_v0 }
  0x2f   :  { %395 = vmatmul.mubr.msk.bf16.vlgmr.msra.gmra.mrb[0].mxu0 %vm73_vm1, %v52_v6 }
  0x30   :  { %434 = vmatprep.mubr.msk.bf16.mxu0 %vm515_vm0, %v514_v0  ;;  %403 = vmatpush3.bf16.msra.mxu1 %v448_v8 }
  0x31   :  { %404 = vmatprep.subr.bf16.mxu1 %v514_v0  ;;  %419 = vmatpush3.bf16.msra.mxu0 %v454_v14 }
  0x32   :  { %420 = vmatprep.subr.bf16.mxu0 %v514_v0 }
  0x34   :  { %405 = vmatpush3.bf16.msra.mxu1 %v449_v9 }
  0x35   :  { %406 = vmatprep.subr.bf16.mxu1 %v514_v0  ;;  %421 = vmatpush3.bf16.msra.mxu0 %v455_v15 }
  0x36   :  { %422 = vmatprep.subr.bf16.mxu0 %v514_v0 }
  0x38   :  { %407 = vmatpush3.bf16.msra.mxu1 %v450_v10 }
  0x39   :  { %408 = vmatprep.subr.bf16.mxu1 %v514_v0  ;;  %423 = vmatpush3.bf16.msra.mxu0 %v456_v16 }
  0x3a   :  { %424 = vmatprep.subr.bf16.mxu0 %v514_v0 }
  0x3c   :  { %409 = vmatpush3.bf16.msra.mxu1 %v451_v11 }
  0x3d   :  { %410 = vmatprep.subr.bf16.mxu1 %v514_v0  ;;  %425 = vmatpush3.bf16.msra.mxu0 %v457_v17 }
  0x3e   :  { %426 = vmatprep.subr.bf16.mxu0 %v514_v0 }
  0x40   :  { %411 = vmatpush3.bf16.msra.mxu1 %v452_v12 }
  0x41   :  { %412 = vmatprep.subr.bf16.mxu1 %v514_v0  ;;  %427 = vmatpush3.bf16.msra.mxu0 %v458_v18 }
  0x42   :  { %428 = vmatprep.subr.bf16.mxu0 %v514_v0 }
  0x44   :  { %413 = vmatpush3.bf16.msra.mxu1 %v453_v13 }
  0x45   :  { %429 = vmatpush3.bf16.msra.mxu0 %v459_v19 }
  0x46   :  { %430 = vmatprep.subr.bf16.mxu0 %v514_v0 }
  0x49   :  { %431 = vmatpush3.bf16.msra.mxu0 %v460_v34 }
  0x4a   :  { %432 = vmatprep.subr.bf16.mxu0 %v514_v0 }
  0x4d   :  { %433 = vmatpush3.bf16.msra.mxu0 %v461_v35 }
 0x102   :  { %v111_v25 = vpop.f32.mrb[0].mxu0 }
 0x103   :  { %v112_v26 = vadd.f32 %v111_v25, %v60_v24  ;;  %v396_v27 = vpop.f32.mrb[1].mxu0 }
 0x104   :  { %v114_v28 = vpop.f32.mrb[2].mxu0 }
 0x105   :  { %v115_v29 = vadd.f32 %v114_v28, %v60_v24  ;;  %v397_v30 = vpop.f32.mrb[3].mxu0  ;;  %v118_v31 = vmax.f32 %v112_v26, 0.0 }
 0x107   :  { %v119_v32 = vmax.f32 %v115_v29, 0.0 }
 0x109   :  { %v120_v33 = vpack.c.bf16 %v119_v32, %v118_v31 }
 0x10b   :  { %415 = vmatmul.mubr.bf16.vlgmr.msra.gmra.mrb[0].mxu1 %v120_v33 }
 0x1de   :  { %v223_v38 = vpop.f32.mrb[0].mxu1 }
 0x1df   :  { %v224_v39 = vadd.f32 %v223_v38, %v140_v37  ;;  %v416_v40 = vpop.f32.mrb[1].mxu1 }
 0x1e0   :  { %v226_v41 = vpop.f32.mrb[2].mxu1 }
 0x1e1   :  { %v227_v42 = vadd.f32 %v226_v41, %v140_v37  ;;  %v417_v43 = vpop.f32.mrb[3].mxu1  ;;  %v230_v44 = vmax.f32 %v224_v39, 0.0 }
 0x1e3   :  { %v231_v45 = vmax.f32 %v227_v42, 0.0 }
 0x1e5   :  { %v232_v46 = vpack.c.bf16 %v231_v45, %v230_v44 }
 0x1e7   :  { %435 = vmatmul.mubr.bf16.vlgmr.msra.gmra.mrb[4].mxu0 %v232_v46 }
 0x2ba   :  { %v335_v49 = vpop.f32.mrb[4].mxu0 }
 0x2bb   :  { %v336_v50 = vadd.f32 %v335_v49, %v252_v48  ;;  %v436_v51 = vpop.f32.mrb[5].mxu0 }
 0x2bc   :  { %v338_v52 = vpop.f32.mrb[6].mxu0 }
 0x2bd   :  { %342 = vst [vmem:[%s620_s5] sm:$0xff] %v336_v50  ;;  %v339_v53 = vadd.f32 %v338_v52, %v252_v48  ;;  %v437_v54 = vpop.f32.mrb[7].mxu0 }
 0x2bf   :  { %343 = vst [vmem:[%s620_s5 + $0x8] sm:$0xff] %v339_v53 }
 0x2c0   :  { %348 = vsyncpa [#allocation3], 1 }
 0x2c1   :  { %349 = vsyncpa [#allocation5], 1 }

</bundles_post_ra>
